<compile_context>
chip_gen: v6e
topology: v6e:2x2x1
jax: 0.10.0
libtpu: 0.0.40
codegen_flags: <defaults>
</compile_context>

<pallas_src>
import math

import jax
import jax.numpy as jnp
from jax.experimental import pallas as pl
from jax.experimental.pallas import tpu as pltpu


def _feature_regression_kernel(x_ref, w_ref, b_ref, o_ref):
    # Wm_T (and the bias) are pre-masked / pre-transposed / pre-packed in the
    # wrapper, so the body is one MXU matmul plus a broadcast add.
    z = jnp.dot(x_ref[...], w_ref[...], preferred_element_type=jnp.float32)
    o_ref[...] = (z + b_ref[...]).astype(o_ref.dtype)


def _round_up(n, m):
    return ((n + m - 1) // m) * m


def feature_regression(x, W, b, *, block_rows=2048, compute_dtype=None):
    """BRITS FeatureRegression forward: x @ (W * (1 - eye(D))).T + b.

    x: (..., D); leading dims are flattened, so the BRITS time loop can be
    fused by passing (batch, T, D) in one call.  W: (D, D), b: (D,).

    block_rows: rows (as seen by the kernel, i.e. packed rows when the
    block-diagonal packing applies) per grid step.  Sweep 1024-4096; the
    kernel is HBM-bound, so only VMEM and per-step overhead matter.

    compute_dtype: optional lower-precision HBM dtype (e.g. jnp.bfloat16).
    The matmul always accumulates in f32.  Off by default.
    """
    D = W.shape[0]
    orig_shape = x.shape
    x2 = x.reshape(-1, D)
    N = x2.shape[0]

    op_dtype = (jnp.dtype(compute_dtype) if compute_dtype is not None
                else jnp.promote_types(x2.dtype, W.dtype))

    # Hoisted diagonal mask + transpose (tiny DxD work, once per call).
    eye = jnp.eye(D, dtype=W.dtype)
    Wm_T = ((W * (1.0 - eye)).T).astype(op_dtype)
    b_row = b.astype(op_dtype)

    # Block-diagonal row packing: keeps stores lane-dense without padding D.
    pack = 128 // D if (D < 128 and 128 % D == 0) else 1
    if pack > 1 and N % pack == 0:
        Dk = pack * D
        Nk = N // pack
        xk = x2.astype(op_dtype).reshape(Nk, Dk)       # free row-major reshape
        Wk = jnp.kron(jnp.eye(pack, dtype=op_dtype), Wm_T)
        bk = jnp.tile(b_row, pack).reshape(1, Dk)
    else:
        Dk, Nk = D, N
        xk = x2.astype(op_dtype)
        Wk = Wm_T
        bk = b_row.reshape(1, D)

    isz = jnp.dtype(op_dtype).itemsize
    cost = pl.CostEstimate(
        flops=2 * N * D * D,
        transcendentals=0,
        bytes_accessed=isz * (2 * Nk * Dk + Dk * Dk + Dk))

    def _vmem_limit(bytes_needed):
        # Raise v5e's 16 MiB scoped default; stay under v7x's 64 MiB physical.
        return int(min(64 << 20, max(32 << 20, 2 * bytes_needed)))

    if Nk <= max(block_rows // 2, 8):
        # Single-block, gridless call: one VMEM tile, no pipelining overhead.
        vmem_needed = isz * (2 * Nk * Dk + Dk * Dk + Dk)
        out = pl.pallas_call(
            _feature_regression_kernel,
            out_shape=jax.ShapeDtypeStruct((Nk, Dk), op_dtype),
            in_specs=[pl.BlockSpec(memory_space=pltpu.MemorySpace.VMEM)] * 3,
            out_specs=pl.BlockSpec(memory_space=pltpu.MemorySpace.VMEM),
            compiler_params=pltpu.CompilerParams(
                vmem_limit_bytes=_vmem_limit(vmem_needed)),
            cost_estimate=cost,
        )(xk, Wk, bk)
    else:
        # Row-tiled grid; W/b stay VMEM-resident (block index (0, 0) every
        # step).  No row padding: cdiv grid + exact out_shape, Pallas masks the
        # partial last block.  Always >= 2 blocks so megacore ("parallel" row
        # axis) can shard across v7x's two TensorCores.
        br = min(block_rows, _round_up(pl.cdiv(Nk, 2), 8))
        grid = (pl.cdiv(Nk, br),)
        vmem_needed = isz * (2 * 2 * br * Dk + 2 * (Dk * Dk + Dk))
        out = pl.pallas_call(
            _feature_regression_kernel,
            out_shape=jax.ShapeDtypeStruct((Nk, Dk), op_dtype),
            grid=grid,
            in_specs=[
                pl.BlockSpec((br, Dk), lambda i: (i, 0)),
                pl.BlockSpec((Dk, Dk), lambda i: (0, 0)),
                pl.BlockSpec((1, Dk), lambda i: (0, 0)),
            ],
            out_specs=pl.BlockSpec((br, Dk), lambda i: (i, 0)),
            compiler_params=pltpu.CompilerParams(
                dimension_semantics=("parallel",),
                vmem_limit_bytes=_vmem_limit(vmem_needed)),
            cost_estimate=cost,
        )(xk, Wk, bk)

    return out.reshape(orig_shape)


def init_params(input_size, key):
    """Deterministic init mirroring reset_parameters(): U(-stdv, stdv)."""
    stdv = 1.0 / math.sqrt(input_size)
    kw, kb = jax.random.split(key)
    W = jax.random.uniform(kw, (input_size, input_size), jnp.float32,
                           minval=-stdv, maxval=stdv)
    b = jax.random.uniform(kb, (input_size,), jnp.float32,
                           minval=-stdv, maxval=stdv)
    return W, b


if __name__ == "__main__":
    key = jax.random.PRNGKey(0)
    k_p, k1, k2, k3 = jax.random.split(key, 4)

    input_size = 32
    W, b = init_params(input_size, k_p)
    mask = jnp.ones((input_size, input_size), jnp.float32) - jnp.eye(input_size)
    Wm_T_ref = (W * mask).T

    def ref_fn(xx):
        return xx @ Wm_T_ref + b

    # Case 1: small per-step call (B, D) -> packed rows, gridless whole-array kernel.
    x1 = jax.random.normal(k1, (8, input_size), jnp.float32)
    o1 = jax.block_until_ready(feature_regression(x1, W, b))
    assert o1.shape == x1.shape and o1.dtype == x1.dtype
    assert jnp.allclose(o1, ref_fn(x1), atol=1e-5, rtol=1e-5), "mismatch (small)"

    # Case 2: time-fused call (B, T, D) -> packed rows, row-tiled grid with a
    # partial last block (600 packed rows = 2*256 + 88), exercising the
    # masked-tail path with an exact (no-pad) out_shape.
    x2 = jax.random.normal(k2, (8, 300, input_size), jnp.float32)
    o2 = jax.block_until_ready(feature_regression(x2, W, b, block_rows=256))
    assert o2.shape == x2.shape
    assert jnp.allclose(o2, ref_fn(x2), atol=1e-5, rtol=1e-5), "mismatch (fused)"

    # Case 3: row count not a multiple of 128//D -> unpacked fallback
    # (last dim stays at D = full array dim; still no padding anywhere).
    x3 = jax.random.normal(k3, (7, input_size), jnp.float32)
    o3 = jax.block_until_ready(feature_regression(x3, W, b))
    assert jnp.allclose(o3, ref_fn(x3), atol=1e-5, rtol=1e-5), "mismatch (ragged)"

    print("KERNEL_OK")
</pallas_src>

<mosaic_0001>
module attributes {stable_mosaic.version = 11 : i64} {
  func.func @_feature_regression_kernel(%arg0: memref<2x128xf32, #tpu.memory_space<vmem>>, %arg1: memref<128x128xf32, #tpu.memory_space<vmem>>, %arg2: memref<1x128xf32, #tpu.memory_space<vmem>>, %arg3: memref<2x128xf32, #tpu.memory_space<vmem>>) attributes {dimension_semantics = [], scalar_prefetch = 0 : i64, scratch_operands = 0 : i64, tpu.core_type = #tpu.core_type<tc>} {
    %c0 = arith.constant 0 : index
    %c0_0 = arith.constant 0 : index
    %0 = vector.load %arg0[%c0, %c0_0] : memref<2x128xf32, #tpu.memory_space<vmem>>, vector<2x128xf32>
    %c0_1 = arith.constant 0 : index
    %c0_2 = arith.constant 0 : index
    %1 = vector.load %arg1[%c0_1, %c0_2] : memref<128x128xf32, #tpu.memory_space<vmem>>, vector<128x128xf32>
    %cst = arith.constant dense<0.000000e+00> : vector<2x128xf32>
    %2 = tpu.matmul %0, %1, %cst {dimension_numbers = #tpu.dot_dimension_numbers<[1], [0], [0], [1], [0, 0, 1, 1], [], []>} : vector<2x128xf32>, vector<128x128xf32>, vector<2x128xf32> -> vector<2x128xf32>
    %c0_3 = arith.constant 0 : index
    %c0_4 = arith.constant 0 : index
    %3 = vector.load %arg2[%c0_3, %c0_4] : memref<1x128xf32, #tpu.memory_space<vmem>>, vector<1x128xf32>
    %4 = vector.broadcast %3 : vector<1x128xf32> to vector<2x128xf32>
    %5 = arith.addf %2, %4 : vector<2x128xf32>
    %c0_5 = arith.constant 0 : index
    %c0_6 = arith.constant 0 : index
    %6 = vector.load %arg3[%c0_5, %c0_6] : memref<2x128xf32, #tpu.memory_space<vmem>>, vector<2x128xf32>
    tpu.vector_store %arg3[%c0_5, %c0_6], %5 {strides = array<i32>} : memref<2x128xf32, #tpu.memory_space<vmem>>, vector<2x128xf32>,
    return
  }
}

</mosaic_0001>

<bundles_post_ra>
// kernel: tpu_custom_call.1
= control target key start
LH: loop header
LB: loop body
LE: loop exit
PB: predicated region body
PF: predicated region fallthrough
CT: control target
= control target key end

     0   :  { %8 = vsyncpa [#allocation3], 0  ;;  %s317_s0 = inlined_call_operand.hbm [shape: f32[2,128], index: 0, kind: input, shape index: {}]   ;;  %s318_s1 = inlined_call_operand.hbm [shape: f32[128,128], index: 1, kind: input, shape index: {}]   ;;  %s319_s2 = inlined_call_operand.vmem [shape: f32[1,128], index: 2, kind: input, shape index: {}]   ;;  %s320_s3 = inlined_call_operand.hbm [shape: f32[2,128], index: 3, kind: output, shape index: {}]  }
   0x1   :  { %9 = vsyncpa [#allocation6], 0 }
   0x2   :  { %10 = vsyncpa [#allocation4], 0  ;;  %s278_s12 = smov [#allocation2]   ;;  %s279_s14 = smov [#allocation5]  }
   0x3   :  { %s17_s13 = sshll.u32 %s278_s12, 4  ;;  %s26_s15 = sshll.u32 %s279_s14, 4  ;;  %s18_s13 = int_to_ptr.vmem [resolvable:$true] %s17_s13  ;;  %s27_s15 = int_to_ptr.vmem [resolvable:$true] %s26_s15 }
   0x4   :  { %s220_s16 = scalar_lea.vmem %s18_s13, 32  ;;  %p225_p1 = scmp.lt.s32.totalorder %s18_s13, %s18_s13 }
   0x5   :  { %p221_p0 = scmp.ne.s32.totalorder %s18_s13, %s220_s16  ;;  %p226_p2 = scmp.lt.s32.totalorder %s220_s16, %s220_s16 }
   0x7   :  { %p227_p3 = por %p226_p2, %p225_p1 }
   0x9   :  { %p228_p4 = pnand %p227_p3, %p221_p0 }
   0xb   :  { %231 = shalt.err (!%p228_p4)
}
   0xc   :  { %20 = dma.hbm_to_vmem [thread:$0]  %s317_s0, 32, %s18_s13, [#allocation3]  }
   0xd   :  { %s240_s19 = scalar_lea.vmem %s27_s15, 2048  ;;  %p245_p6 = scmp.lt.s32.totalorder %s27_s15, %s27_s15 }
   0xe   :  { %p241_p5 = scmp.ne.s32.totalorder %s27_s15, %s240_s19  ;;  %p246_p7 = scmp.lt.s32.totalorder %s240_s19, %s240_s19 }
  0x10   :  { %p247_p8 = por %p246_p7, %p245_p6 }
  0x12   :  { %p248_p9 = pnand %p247_p8, %p241_p5 }
  0x14   :  { %251 = shalt.err (!%p248_p9)
}
  0x15   :  { %s280_s20 = smov 128   ;;  %s281_s21 = smov 8  }
  0x16   :  { %32 = dma.hbm_to_vmem [thread:$0]  %s318_s1, 2048, %s27_s15, [#allocation6], %s280_s20, %s280_s20, %s281_s21  }
  0x17   :  { %272 = dma.done.wait [#allocation3], 32  }
  0x18   :  { %273 = vsyncadd [#allocation3], 4294967264 }
  0x19   :  { %274 = dma.done.wait [#allocation6], 2048  }
  0x1a   :  { %275 = vsyncadd [#allocation6], 4294965248  ;;  %v282_v0 = vmov 0.0   ;;  %vm283_vm0 = vmmov 0   ;;  %v57_v1 = vld [vmem:[#allocation5 + $0x78] sm:$0xff]  ;;  %v56_v2 = vld [vmem:[#allocation5 + $0x70] sm:$0xff] }
  0x1b   :  { %170 = vmatprep.subr.mxu0 %v282_v0  ;;  %202 = vmatprep.mubr.msk.f32.mxu0 %vm283_vm0, %v282_v0  ;;  %v55_v3 = vld [vmem:[#allocation5 + $0x68] sm:$0xff]  ;;  %v54_v4 = vld [vmem:[#allocation5 + $0x60] sm:$0xff]  ;;  %v53_v5 = vld [vmem:[#allocation5 + $0x58] sm:$0xff]  ;;  %s284_s24 = smov [#allocation7]  }
  0x1c   :  { %171 = vmatpush3.msra.mxu0 %v57_v1  ;;  %v52_v6 = vld [vmem:[#allocation5 + $0x50] sm:$0xff]  ;;  %v51_v7 = vld [vmem:[#allocation5 + $0x48] sm:$0xff]  ;;  %v50_v8 = vld [vmem:[#allocation5 + $0x40] sm:$0xff]  ;;  %s142_s25 = sshll.u32 %s284_s24, 4  ;;  %s143_s25 = int_to_ptr.vmem [resolvable:$true] %s142_s25 }
  0x1d   :  { %172 = vmatprep.subr.mxu0 %v282_v0  ;;  %v49_v9 = vld [vmem:[#allocation5 + $0x38] sm:$0xff]  ;;  %v48_v10 = vld [vmem:[#allocation5 + $0x30] sm:$0xff]  ;;  %v47_v11 = vld [vmem:[#allocation5 + $0x28] sm:$0xff]  ;;  %s252_s26 = scalar_lea.vmem %s143_s25, 32  ;;  %p257_p11 = scmp.lt.s32.totalorder %s143_s25, %s143_s25 }
  0x1e   :  { %173 = vmatpush3.msra.mxu0 %v56_v2  ;;  %v46_v12 = vld [vmem:[#allocation5 + $0x20] sm:$0xff]  ;;  %v45_v13 = vld [vmem:[#allocation5 + $0x18] sm:$0xff]  ;;  %v44_v14 = vld [vmem:[#allocation5 + $0x10] sm:$0xff]  ;;  %p253_p10 = scmp.ne.s32.totalorder %s143_s25, %s252_s26  ;;  %p258_p12 = scmp.lt.s32.totalorder %s252_s26, %s252_s26 }
  0x1f   :  { %174 = vmatprep.subr.mxu0 %v282_v0  ;;  %v43_v15 = vld [vmem:[#allocation5 + $0x8] sm:$0xff]  ;;  %v42_v16 = vld [vmem:[#allocation5] sm:$0xff]  ;;  %v41_v17 = vld [vmem:[#allocation2] sm:$0x3] }
  0x20   :  { %175 = vmatpush3.msra.mxu0 %v55_v3  ;;  %v152_v18 = vld [vmem:[%s319_s2] ss:$0 sm:$0xff]  ;;  %p259_p13 = por %p258_p12, %p257_p11 }
  0x21   :  { %176 = vmatprep.subr.mxu0 %v282_v0 }
  0x22   :  { %177 = vmatpush3.msra.mxu0 %v54_v4  ;;  %p260_p0 = pnand %p259_p13, %p253_p10 }
  0x23   :  { %178 = vmatprep.subr.mxu0 %v282_v0 }
  0x24   :  { %179 = vmatpush3.msra.mxu0 %v53_v5 }
  0x25   :  { %180 = vmatprep.subr.mxu0 %v282_v0 }
  0x26   :  { %181 = vmatpush3.msra.mxu0 %v52_v6 }
  0x27   :  { %182 = vmatprep.subr.mxu0 %v282_v0 }
  0x28   :  { %183 = vmatpush3.msra.mxu0 %v51_v7 }
  0x29   :  { %184 = vmatprep.subr.mxu0 %v282_v0 }
  0x2a   :  { %185 = vmatpush3.msra.mxu0 %v50_v8 }
  0x2b   :  { %186 = vmatprep.subr.mxu0 %v282_v0 }
  0x2c   :  { %187 = vmatpush3.msra.mxu0 %v49_v9 }
  0x2d   :  { %188 = vmatprep.subr.mxu0 %v282_v0 }
  0x2e   :  { %189 = vmatpush3.msra.mxu0 %v48_v10 }
  0x2f   :  { %190 = vmatprep.subr.mxu0 %v282_v0 }
  0x30   :  { %191 = vmatpush3.msra.mxu0 %v47_v11 }
  0x31   :  { %192 = vmatprep.subr.mxu0 %v282_v0 }
  0x32   :  { %193 = vmatpush3.msra.mxu0 %v46_v12 }
  0x33   :  { %194 = vmatprep.subr.mxu0 %v282_v0 }
  0x34   :  { %195 = vmatpush3.msra.mxu0 %v45_v13 }
  0x35   :  { %196 = vmatprep.subr.mxu0 %v282_v0 }
  0x36   :  { %197 = vmatpush3.msra.mxu0 %v44_v14 }
  0x37   :  { %198 = vmatprep.subr.mxu0 %v282_v0 }
  0x38   :  { %199 = vmatpush3.msra.mxu0 %v43_v15 }
  0x39   :  { %200 = vmatprep.subr.mxu0 %v282_v0 }
  0x3a   :  { %201 = vmatpush3.msra.mxu0 %v42_v16 }
  0x3b   :  { %203 = vmatmul.mubr.f32.vlgmr.msra.gmra.mxu0 %v41_v17 }
  0xfb   :  { %v131_v19 = vpop.f32.mrf.mxu0 }
  0xfc   :  { %v132_v20 = vadd.f32 %v152_v18, %v131_v19 }
  0xfd   :  { %v204_v21 = vpop.f32.mrf.mxu0 }
  0xfe   :  { %135 = vst [vmem:[#allocation7] sm:$0x3] %v132_v20 }
  0xff   :  { %263 = shalt.err (!%p260_p0)
}
 0x100   :  { %145 = dma.vmem_to_hbm [thread:$0]  %s143_s25, 32, %s320_s3, [#allocation4]  }
 0x101   :  { %276 = dma.done.wait [#allocation4], 32  }
 0x102   :  { %277 = vsyncadd [#allocation4], 4294967264 }
 0x103   :  { %149 = vsyncpa [#allocation3], 1 }
 0x104   :  { %150 = vsyncpa [#allocation6], 1 }
 0x105   :  { %151 = vsyncpa [#allocation4], 1 }

</bundles_post_ra>
